<compile_context>
chip_gen: v6e
topology: v6e:2x2x1
jax: 0.10.0
libtpu: 0.0.40
codegen_flags: <defaults>
</compile_context>

<pallas_src>
import math
from functools import partial

import numpy as np

import jax
import jax.numpy as jnp
from jax.experimental import pallas as pl
from jax.experimental.pallas import tpu as pltpu


# ------------------------------------------------------------------------
# Group machinery (mirrors the numpy setup done in the PyTorch __init__).
# We use the cyclic group Z_order; neighborhood = first `nbr_size` elements.
# ------------------------------------------------------------------------
def generate_neighborhood(group, order, nbr_size):
    assert group == "cyclic"
    return list(range(nbr_size))


def get_nbrhood_elements(nbrhood):
    return list(nbrhood)


def cyclic_group_matrix(order):
    i = np.arange(order)
    return (i[:, None] + i[None, :]) % order  # Cayley table of Z_order


def _round_up(x, m):
    return ((x + m - 1) // m) * m


def _pick_tile_m(mp, cap):
    """Largest multiple of 8 that divides mp and is <= cap (mp is a mult. of 8)."""
    t = min(cap, mp)
    t -= t % 8
    while t >= 8:
        if mp % t == 0:
            return t
        t -= 8
    return 8


# ------------------------------------------------------------------------
# Pallas kernel: one output tile per grid step.
#   x_ref : (tm, G)  f32   (cast to bf16 in VMEM — no wrapper-side cast pass)
#   w_ref : (G,  tn) bf16  (weight-stationary: constant index over the M axis)
#   b_ref : (1,  tn) f32
#   o_ref : (tm, tn) f32
# Single K step => no accumulator scratch, bias folded into the store.
# ------------------------------------------------------------------------
def gmconv_kernel(x_ref, w_ref, b_ref, o_ref):
    x = x_ref[...].astype(jnp.bfloat16)
    acc = jnp.dot(x, w_ref[...], preferred_element_type=jnp.float32)
    o_ref[...] = (acc + b_ref[...]).astype(o_ref.dtype)


@partial(jax.jit, static_argnames=("tm", "tn"))
def _gmconv_forward(x2, w_t, bias_row, *, tm, tn):
    """x2: (Mp, G) f32, w_t: (G, Np) bf16, bias_row: (1, Np) f32 -> (Mp, Np) f32."""
    Mp, G = x2.shape
    _, Np = w_t.shape
    grid = (Mp // tm, Np // tn)

    flops = 2 * Mp * Np * G
    bytes_accessed = Mp * G * 4 + G * Np * 2 + Np * 4 + Mp * Np * 4

    return pl.pallas_call(
        gmconv_kernel,
        out_shape=jax.ShapeDtypeStruct((Mp, Np), jnp.float32),
        grid_spec=pltpu.PrefetchScalarGridSpec(
            num_scalar_prefetch=0,
            grid=grid,
            in_specs=[
                # x tile depends only on the M index -> fetched once per M block.
                pl.BlockSpec((tm, G), lambda i, j: (i, 0)),
                # Weight / bias do not depend on the M index; when Np == tn
                # (common case) the index is constant -> DMA'd exactly once.
                pl.BlockSpec((G, tn), lambda i, j: (0, j)),
                pl.BlockSpec((1, tn), lambda i, j: (0, j)),
            ],
            out_specs=pl.BlockSpec((tm, tn), lambda i, j: (i, j)),
        ),
        compiler_params=pltpu.CompilerParams(
            dimension_semantics=("parallel", "parallel"),
            vmem_limit_bytes=48 * 1024 * 1024,  # > v5e 16MiB default, < v7x 64MiB phys
        ),
        cost_estimate=pl.CostEstimate(
            flops=flops, transcendentals=0, bytes_accessed=bytes_accessed
        ),
    )(x2, w_t, bias_row)


class GMConv:
    """JAX/Pallas re-implementation of GMConvBase's GM convolution."""

    # Cap on the lane (N = O*G) tile; above this N is tiled and padded.
    _TN_CAP = 2048
    # Cap on the batch tile.
    _TM_CAP = 512

    def __init__(self, group, order, nbr_size, group_matrix, out_channels, key):
        self.order = order
        self.out_channels = out_channels

        self.nbrhood = generate_neighborhood(group, order, nbr_size)
        self.target_elements = get_nbrhood_elements(self.nbrhood)
        # (T, G): for each target element t, where it sits in each row of
        # group_matrix.T (same construction as the PyTorch __init__).
        self.index_matrix = np.array(
            [np.where(group_matrix.T == element)[1] for element in self.target_elements]
        )
        T = len(self.target_elements)
        assert self.index_matrix.shape == (T, order)

        # Parameters (deterministic, matching torch shapes + kaiming_uniform_
        # with a=sqrt(5): bound = 1/sqrt(fan_in), fan_in = 1 * T).
        bound = 1.0 / math.sqrt(1 * T)
        self.weight_coeff = jax.random.uniform(
            key, (out_channels, 1, T), jnp.float32, minval=-bound, maxval=bound
        )
        self.bias = jnp.zeros((out_channels,), jnp.float32)

        # N (= O*G) tiling: keep the whole lane extent in one block when it
        # fits (full-extent blocks are exempt from the 128-divisibility rule,
        # so no N padding either); otherwise use 2048-wide lane tiles.
        N = out_channels * order
        if N <= self._TN_CAP:
            self._tn, self._np = N, N
        else:
            self._tn = self._TN_CAP
            self._np = _round_up(N, self._tn)

        self._rebuild_expanded_params()

    def _rebuild_expanded_params(self):
        """Bake (weight_coeff, bias) into the bf16 GM-conv weight the Pallas
        matmul consumes.  Call once per parameter update, not per forward."""
        O, G = self.out_channels, self.order
        idx = jnp.asarray(self.index_matrix)                       # (T, G) int
        coeff = self.weight_coeff[:, 0, :]                         # (O, T)
        u = jnp.broadcast_to(jnp.arange(G)[None, :], idx.shape)    # (T, G)
        # Scatter-add: W[o, u, idx[t, u]] += coeff[o, t]  (no dense one-hot).
        W = jnp.zeros((O, G, G), jnp.float32).at[:, u, idx].add(coeff[:, :, None])
        W_T = W.reshape(O * G, G).T.astype(jnp.bfloat16)           # (G, O*G)
        bias_row = jnp.repeat(self.bias, G)[None, :]               # (1, O*G)

        N = O * G
        if self._np != N:  # only when N itself is tiled (N > _TN_CAP)
            W_T = jnp.zeros((G, self._np), jnp.bfloat16).at[:, :N].set(W_T)
            bias_row = jnp.zeros((1, self._np), jnp.float32).at[:, :N].set(bias_row)

        self._w_t = W_T
        self._bias_row = bias_row.astype(jnp.float32)

    def __call__(self, x):
        # x: (B, 1, G) float32
        B, C, G = x.shape
        assert C == 1 and G == self.order
        N = self.out_channels * self.order

        x2 = x[:, 0, :]
        Mp = _round_up(max(B, 1), 8)          # pad M to sublane multiple only
        tm = _pick_tile_m(Mp, self._TM_CAP)   # divisor of Mp -> no extra M pad
        if Mp // tm < 2 and Mp >= 16:         # give v7x's 2 TCs >= 2 M blocks
            tm = _pick_tile_m(Mp, Mp // 2)
        if Mp != B:
            x2 = jnp.pad(x2, ((0, Mp - B), (0, 0)))

        y = _gmconv_forward(x2, self._w_t, self._bias_row, tm=tm, tn=self._tn)

        if Mp != B or self._np != N:
            y = y[:B, :N]
        return y.reshape(B, self.out_channels, self.order)


def reference_forward(layer, x):
    """Pure-JAX f32 reference implementing the gather formulation directly."""
    coeff = layer.weight_coeff[:, 0, :]           # (O, T)
    idx = jnp.asarray(layer.index_matrix)         # (T, G)
    x2 = x[:, 0, :]                               # (B, G)
    gathered = x2[:, idx]                         # (B, T, G)
    y = jnp.einsum("ot,btg->bog", coeff, gathered)
    return y + layer.bias[None, :, None]


if __name__ == "__main__":
    key = jax.random.PRNGKey(0)
    k_param, k_x = jax.random.split(key)

    order = 16          # group order G
    nbr_size = 5        # neighborhood size T
    out_channels = 8
    batch = 4

    gm = cyclic_group_matrix(order)
    layer = GMConv("cyclic", order, nbr_size, gm, out_channels, k_param)

    x = jax.random.normal(k_x, (batch, 1, order), dtype=jnp.float32)

    out = jax.block_until_ready(layer(x))
    ref = jax.block_until_ready(reference_forward(layer, x))

    # bf16 operands / f32 accumulation in the kernel vs. f32 reference.
    np.testing.assert_allclose(np.asarray(out), np.asarray(ref), rtol=2e-2, atol=2e-2)
    assert out.shape == (batch, out_channels, order)

    print("KERNEL_OK")
</pallas_src>

<mosaic_0001>
module attributes {stable_mosaic.version = 11 : i64} {
  func.func @gmconv_kernel(%arg0: i32, %arg1: i32, %arg2: memref<8x16xf32, #tpu.memory_space<vmem>>, %arg3: memref<16x128xbf16, #tpu.memory_space<vmem>>, %arg4: memref<1x128xf32, #tpu.memory_space<vmem>>, %arg5: memref<8x128xf32, #tpu.memory_space<vmem>>) attributes {dimension_semantics = [#tpu.dimension_semantics<parallel>, #tpu.dimension_semantics<parallel>], iteration_bounds = array<i64: 1, 1>, scalar_prefetch = 0 : i64, scratch_operands = 0 : i64, tpu.core_type = #tpu.core_type<tc>, window_params = [{transform_indices = @transform_0, window_bounds = array<i64: 8, 16>}, {transform_indices = @transform_1, window_bounds = array<i64: 16, 128>}, {transform_indices = @transform_2, window_bounds = array<i64: 1, 128>}, {transform_indices = @transform_3, window_bounds = array<i64: 8, 128>}]} {
    %c0 = arith.constant 0 : index
    %c0_0 = arith.constant 0 : index
    %0 = vector.load %arg2[%c0, %c0_0] : memref<8x16xf32, #tpu.memory_space<vmem>>, vector<8x16xf32>
    %1 = arith.truncf %0 : vector<8x16xf32> to vector<8x16xbf16>
    %c0_1 = arith.constant 0 : index
    %c0_2 = arith.constant 0 : index
    %2 = vector.load %arg3[%c0_1, %c0_2] : memref<16x128xbf16, #tpu.memory_space<vmem>>, vector<16x128xbf16>
    %cst = arith.constant dense<0.000000e+00> : vector<8x128xf32>
    %3 = tpu.matmul %1, %2, %cst {dimension_numbers = #tpu.dot_dimension_numbers<[1], [0], [0], [1], [0, 0, 1, 1], [], []>} : vector<8x16xbf16>, vector<16x128xbf16>, vector<8x128xf32> -> vector<8x128xf32>
    %c0_3 = arith.constant 0 : index
    %c0_4 = arith.constant 0 : index
    %4 = vector.load %arg4[%c0_3, %c0_4] : memref<1x128xf32, #tpu.memory_space<vmem>>, vector<1x128xf32>
    %5 = vector.broadcast %4 : vector<1x128xf32> to vector<8x128xf32>
    %6 = arith.addf %3, %5 : vector<8x128xf32>
    %c0_5 = arith.constant 0 : index
    %c0_6 = arith.constant 0 : index
    %7 = vector.load %arg5[%c0_5, %c0_6] : memref<8x128xf32, #tpu.memory_space<vmem>>, vector<8x128xf32>
    tpu.vector_store %arg5[%c0_5, %c0_6], %6 {strides = array<i32>} : memref<8x128xf32, #tpu.memory_space<vmem>>, vector<8x128xf32>,
    return
  }
  func.func @transform_0(%arg0: i32, %arg1: i32) -> (i32, i32) {
    %c0_i32 = arith.constant 0 : i32
    %c0_i32_0 = arith.constant 0 : i32
    return %arg0, %c0_i32 : i32, i32
  }
  func.func @transform_1(%arg0: i32, %arg1: i32) -> (i32, i32) {
    %c0_i32 = arith.constant 0 : i32
    %c0_i32_0 = arith.constant 0 : i32
    return %c0_i32, %arg1 : i32, i32
  }
  func.func @transform_2(%arg0: i32, %arg1: i32) -> (i32, i32) {
    %c0_i32 = arith.constant 0 : i32
    %c0_i32_0 = arith.constant 0 : i32
    return %c0_i32, %arg1 : i32, i32
  }
  func.func @transform_3(%arg0: i32, %arg1: i32) -> (i32, i32) {
    %c0_i32 = arith.constant 0 : i32
    return %arg0, %arg1 : i32, i32
  }
}

</mosaic_0001>

<bundles_post_ra>
// kernel: _gmconv_forward.1
= control target key start
LH: loop header
LB: loop body
LE: loop exit
PB: predicated region body
PF: predicated region fallthrough
CT: control target
= control target key end

     0   :  { %8 = vsyncpa [#allocation3], 0  ;;  %s244_s0 = inlined_call_operand.hbm [shape: f32[8,16], index: 0, kind: input, shape index: {}]   ;;  %s245_s1 = inlined_call_operand.hbm [shape: bf16[16,128], index: 1, kind: input, shape index: {}]   ;;  %s246_s2 = inlined_call_operand.vmem [shape: f32[1,128], index: 2, kind: input, shape index: {}]   ;;  %s247_s3 = inlined_call_operand.hbm [shape: f32[8,128], index: 3, kind: output, shape index: {}]  }
   0x1   :  { %9 = vsyncpa [#allocation6], 0 }
   0x2   :  { %10 = vsyncpa [#allocation4], 0  ;;  %s205_s12 = smov [#allocation2]   ;;  %s206_s14 = smov [#allocation5]  }
   0x3   :  { %s17_s13 = sshll.u32 %s205_s12, 4  ;;  %s26_s15 = sshll.u32 %s206_s14, 4  ;;  %s18_s13 = int_to_ptr.vmem [resolvable:$true] %s17_s13  ;;  %s27_s15 = int_to_ptr.vmem [resolvable:$true] %s26_s15 }
   0x4   :  { %s147_s16 = scalar_lea.vmem %s18_s13, 128  ;;  %p152_p1 = scmp.lt.s32.totalorder %s18_s13, %s18_s13 }
   0x5   :  { %p148_p0 = scmp.ne.s32.totalorder %s18_s13, %s147_s16  ;;  %p153_p2 = scmp.lt.s32.totalorder %s147_s16, %s147_s16 }
   0x7   :  { %p154_p3 = por %p153_p2, %p152_p1 }
   0x9   :  { %p155_p4 = pnand %p154_p3, %p148_p0 }
   0xb   :  { %158 = shalt.err (!%p155_p4)
}
   0xc   :  { %20 = dma.hbm_to_vmem [thread:$0]  %s244_s0, 128, %s18_s13, [#allocation3]  }
   0xd   :  { %s167_s19 = scalar_lea.vmem %s27_s15, 128  ;;  %p172_p6 = scmp.lt.s32.totalorder %s27_s15, %s27_s15 }
   0xe   :  { %p168_p5 = scmp.ne.s32.totalorder %s27_s15, %s167_s19  ;;  %p173_p7 = scmp.lt.s32.totalorder %s167_s19, %s167_s19 }
  0x10   :  { %p174_p8 = por %p173_p7, %p172_p6 }
  0x12   :  { %p175_p9 = pnand %p174_p8, %p168_p5 }
  0x14   :  { %178 = shalt.err (!%p175_p9)
}
  0x15   :  { %s207_s20 = smov 64   ;;  %s208_s21 = smov 4  }
  0x16   :  { %32 = dma.hbm_to_vmem [thread:$0]  %s245_s1, 128, %s27_s15, [#allocation6], %s207_s20, %s207_s20, %s208_s21  }
  0x17   :  { %199 = dma.done.wait [#allocation3], 128  }
  0x18   :  { %200 = vsyncadd [#allocation3], 4294967168 }
  0x19   :  { %201 = dma.done.wait [#allocation6], 128  }
  0x1a   :  { %202 = vsyncadd [#allocation6], 4294967168  ;;  %v209_v0 = vmov 0.0   ;;  %vm210_vm0 = vmmov 0   ;;  %v138_v1 = vld [vmem:[#allocation5] sm:$0xff]   ;;  %v42_v2 = vld [vmem:[#allocation2] sm:$0xff] }
  0x1b   :  { %125 = vmatprep.subr.bf16.mxu0 %v209_v0  ;;  %127 = vmatprep.mubr.msk.bf16.mxu0 %vm210_vm0, %v209_v0  ;;  %v43_v3 = vpack.c.bf16 %v42_v2, %v42_v2  ;;  %vm59_vm1 = vcmask 130048   ;;  %v120_v4 = vld [vmem:[%s246_s2] ss:$0 sm:$0xff]  ;;  %s211_s25 = smov [#allocation7]  }
  0x1c   :  { %126 = vmatpush3.bf16.msra.mxu0 %v138_v1  ;;  %s110_s1 = sshll.u32 %s211_s25, 4  ;;  %s111_s1 = int_to_ptr.vmem [resolvable:$true] %s110_s1 }
  0x1d   :  { %s179_s26 = scalar_lea.vmem %s111_s1, 128  ;;  %p184_p11 = scmp.lt.s32.totalorder %s111_s1, %s111_s1 }
  0x1e   :  { %p180_p10 = scmp.ne.s32.totalorder %s111_s1, %s179_s26  ;;  %p185_p12 = scmp.lt.s32.totalorder %s179_s26, %s179_s26 }
  0x1f   :  { %128 = vmatmul.mubr.msk.bf16.vlgmr.msra.gmra.mxu0 %vm59_vm1, %v43_v3 }
  0x20   :  { %p186_p13 = por %p185_p12, %p184_p11 }
  0x22   :  { %p187_p0 = pnand %p186_p13, %p180_p10 }
  0xdf   :  { %v97_v5 = vpop.f32.mrf.mxu0 }
  0xe0   :  { %v98_v6 = vadd.f32 %v120_v4, %v97_v5 }
  0xe1   :  { %v129_v7 = vpop.f32.mrf.mxu0 }
  0xe2   :  { %103 = vst [vmem:[#allocation7] sm:$0xff] %v98_v6 }
  0xe3   :  { %v100_v8 = vpop.f32.mrf.mxu0 }
  0xe4   :  { %190 = shalt.err (!%p187_p0)
}
  0xe5   :  { %113 = dma.vmem_to_hbm [thread:$0]  %s111_s1, 128, %s247_s3, [#allocation4]   ;;  %v130_v9 = vpop.f32.mrf.mxu0 }
  0xe6   :  { %203 = dma.done.wait [#allocation4], 128  }
  0xe7   :  { %204 = vsyncadd [#allocation4], 4294967168 }
  0xe8   :  { %117 = vsyncpa [#allocation3], 1 }
  0xe9   :  { %118 = vsyncpa [#allocation6], 1 }
  0xea   :  { %119 = vsyncpa [#allocation4], 1 }

</bundles_post_ra>
